<compile_context>
chip_gen: v5e
topology: v5e:2x2
jax: 0.10.0
libtpu: 0.0.40
codegen_flags: <defaults>
</compile_context>

<pallas_src>
import functools

import numpy as np

import jax
import jax.numpy as jnp
from jax.experimental import pallas as pl
from jax.experimental.pallas import tpu as pltpu


_DEFAULT_BLOCK_ELEMS = 1024 * 1024   # 4 MiB f32 per tile (good for v6e/v7x, fine on v5e)
_MIN_PALLAS_ELEMS = 64 * 1024        # below this a tiny fused XLA op beats the launch cost


def _emphasis_kernel(alpha_ref, x_cur_ref, x_prev_ref, o_ref):
    """One output tile of: out = alpha * reflect_pad_left_1(x).

    alpha_ref : SMEM (1,)     scalar scale (the k=1 "conv" weight)
    x_cur_ref : VMEM (1, B)   input elements [j*B, j*B + B)
    x_prev_ref: VMEM (1, 128) input elements [j*B - 128, j*B)   (meaningful for j > 0)
    o_ref     : VMEM (1, B)   output elements [j*B, j*B + B)
    """
    a = alpha_ref[0]
    x = x_cur_ref[...]                                   # (1, B)

    # rolled[0, t] = x[0, t - 1] for t >= 1 (lane 0 fixed up below).  XLU op,
    # so the per-element VPU work is exactly one multiply.
    rolled = pltpu.roll(x, shift=1, axis=1)

    # Full, lane-aligned, unmasked store of the whole tile.
    o_ref[...] = a * rolled

    j = pl.program_id(0)

    # Patch lane 0 with a single-element store (no full-tile iota/select).
    @pl.when(j == 0)
    def _():
        # Reflect pad: out[0] = alpha * x[1]
        o_ref[:, 0:1] = a * x_cur_ref[:, 1:2]

    @pl.when(j > 0)
    def _():
        # out[j*B] = alpha * x[j*B - 1]  (last element of the previous 128-chunk)
        o_ref[:, 0:1] = a * x_prev_ref[:, 127:128]


def _emphasis_xla(waveform, alpha):
    """Fused XLA fallback: alpha * reflect_pad_left_1(waveform)."""
    return alpha * jnp.concatenate([waveform[:, 1:2], waveform], axis=1)


def emphasis_apply(waveform, alpha, *, block_elems=_DEFAULT_BLOCK_ELEMS,
                   min_pallas_elems=_MIN_PALLAS_ELEMS):
    """Reflect-pad-left(1) then scale by alpha.  waveform: (C, T) -> (C, T+1)."""
    C, T = waveform.shape
    if T < 2:
        # PyTorch's reflect pad also rejects T == 1.
        raise ValueError("EmphasisFilter requires T >= 2 for reflect padding")

    alpha = jnp.asarray(alpha, waveform.dtype).reshape(1)

    block = int(block_elems)
    assert block % 128 == 0, "block_elems must be a multiple of 128 lanes"

    # Fallback gate decoupled from the tile size: only genuinely small
    # waveforms (or the C != 1 shapes the reference conv can't take) go to XLA.
    if C != 1 or T < max(int(min_pallas_elems), 256):
        return _emphasis_xla(waveform, alpha)

    # Shrink the tile (multiple of 128) so there are always >= 2 pipelined
    # grid steps even for shorter waveforms.
    block = min(block, 128 * pl.cdiv(T, 256))

    n_out = T + 1
    grid = (pl.cdiv(n_out, block),)
    chunks_per_block = block // 128
    # If T % block == 0 there is one extra output block whose only valid lane
    # (lane 0) comes from x_prev; clamp the "current" input block index so its
    # DMA never starts past the end of the input.
    last_in_block = pl.cdiv(T, block) - 1

    cur_spec = pl.BlockSpec((1, block),
                            lambda j: (0, jnp.minimum(j, last_in_block)))
    # Trailing 128 input elements of the previous block (tiny 512 B DMA).
    prev_spec = pl.BlockSpec((1, 128),
                             lambda j: (0, jnp.maximum(j * chunks_per_block - 1, 0)))
    out_spec = pl.BlockSpec((1, block), lambda j: (0, j))

    itemsize = int(waveform.dtype.itemsize)
    cost = pl.CostEstimate(
        flops=int(n_out),                                     # one multiply / output elem
        transcendentals=0,
        bytes_accessed=int(itemsize * (T + n_out + 128 * grid[0])),
    )

    return pl.pallas_call(
        _emphasis_kernel,
        out_shape=jax.ShapeDtypeStruct((1, n_out), waveform.dtype),
        grid=grid,
        in_specs=[
            pl.BlockSpec(memory_space=pltpu.MemorySpace.SMEM),   # alpha scalar
            cur_spec,                                            # current time block
            prev_spec,                                           # trailing 128 elems of prev block
        ],
        out_specs=out_spec,
        compiler_params=pltpu.CompilerParams(
            # TODO(synk): on v7x, verify megacore split in a profile; switch to
            # pltpu.CORE_PARALLEL only if one TC is doing all the steps.
            dimension_semantics=("parallel",),
            vmem_limit_bytes=48 * 1024 * 1024,
        ),
        cost_estimate=cost,
    )(alpha, waveform, waveform)


def emphasis_filter_forward(waveform, rng=None, *, p=0.5, lower=-0.5, upper=0.5,
                            **apply_kwargs):
    """JAX/Pallas equivalent of EmphasisFilter.forward.

    The Bernoulli draw changes the *rank* of the result ((1, T+1) vs (T,)), so
    it is a structural decision; it (and the alpha draw) use host-side numpy
    RNG, mirroring torch.rand(1) and avoiding any device->host sync on the
    dispatch path.
    """
    if rng is None:
        rng = np.random.default_rng()
    if rng.uniform() < p:
        alpha = (lower - upper) * rng.uniform() + upper      # host scalar, async upload
        return emphasis_apply(waveform, alpha, **apply_kwargs)
    # TODO(synk): skip branch returns waveform[0] with a different rank than the
    # filter branch, so the two cannot be fused into a single lax.cond program.
    return waveform[0]


if __name__ == "__main__":
    root = jax.random.PRNGKey(0)
    k1, k2, k3, k_fwd = jax.random.split(root, 4)

    lower, upper = -0.5, 0.5
    host_rng = np.random.default_rng(0)
    alpha = float((lower - upper) * host_rng.uniform() + upper)

    # Small blocks so the demo shapes exercise several pipelined grid steps.
    apply_fn = jax.jit(functools.partial(emphasis_apply,
                                         block_elems=1024, min_pallas_elems=0))

    # 1) Pallas path, partial final block (T+1 not a multiple of the block).
    # 2) Pallas path, T an exact multiple of the block (extra 1-element block).
    # 3) Short waveform -> fused XLA fallback path.
    for k, T in ((k1, 4417), (k2, 4096), (k3, 16)):
        x = jax.random.normal(k, (1, T), dtype=jnp.float32)
        out = jax.block_until_ready(apply_fn(x, alpha))
        ref = _emphasis_xla(x, jnp.asarray(alpha, x.dtype).reshape(1))
        assert out.shape == (1, T + 1), (T, out.shape)
        assert jnp.allclose(out, ref, atol=1e-6, rtol=1e-6), (
            T, float(jnp.max(jnp.abs(out - ref))))

    # Full module forward; p=1.0 deterministically takes the filter branch.
    x = jax.random.normal(k_fwd, (1, 4417), dtype=jnp.float32)
    out = jax.block_until_ready(
        emphasis_filter_forward(x, np.random.default_rng(1), p=1.0,
                                lower=lower, upper=upper,
                                block_elems=1024, min_pallas_elems=0))
    assert out.shape == (1, x.shape[1] + 1), out.shape

    # Skip branch (p=0.0) returns waveform[0], shape (T,).
    out_skip = jax.block_until_ready(
        emphasis_filter_forward(x, np.random.default_rng(2), p=0.0))
    assert out_skip.shape == (x.shape[1],), out_skip.shape

    print("KERNEL_OK")
</pallas_src>

<mosaic_0001>
module attributes {stable_mosaic.version = 11 : i64} {
  func.func @_emphasis_kernel(%arg0: i32, %arg1: memref<1xf32, #tpu.memory_space<smem>>, %arg2: memref<1x1024xf32, #tpu.memory_space<vmem>>, %arg3: memref<1x128xf32, #tpu.memory_space<vmem>>, %arg4: memref<1x1024xf32, #tpu.memory_space<vmem>>) attributes {dimension_semantics = [#tpu.dimension_semantics<parallel>], iteration_bounds = array<i64: 5>, scalar_prefetch = 0 : i64, scratch_operands = 0 : i64, tpu.core_type = #tpu.core_type<tc>, window_params = [{transform_indices = @transform_0, window_bounds = array<i64: 1>}, {transform_indices = @transform_1, window_bounds = array<i64: 1, 1024>}, {transform_indices = @transform_2, window_bounds = array<i64: 1, 128>}, {transform_indices = @transform_3, window_bounds = array<i64: 1, 1024>}]} {
    %c0 = arith.constant 0 : index
    %0 = memref.load %arg1[%c0] : memref<1xf32, #tpu.memory_space<smem>>
    %c0_0 = arith.constant 0 : index
    %c0_1 = arith.constant 0 : index
    %1 = vector.load %arg2[%c0_0, %c0_1] : memref<1x1024xf32, #tpu.memory_space<vmem>>, vector<1x1024xf32>
    %c1_i32 = arith.constant 1 : i32
    %2 = tpu.dynamic_rotate %1 by %c1_i32 dim 1 : vector<1x1024xf32>, i32 -> vector<1x1024xf32>
    %3 = vector.broadcast %0 : f32 to vector<1x1024xf32>
    %4 = arith.mulf %3, %2 : vector<1x1024xf32>
    %c0_2 = arith.constant 0 : index
    %c0_3 = arith.constant 0 : index
    %5 = vector.load %arg4[%c0_2, %c0_3] : memref<1x1024xf32, #tpu.memory_space<vmem>>, vector<1x1024xf32>
    tpu.vector_store %arg4[%c0_2, %c0_3], %4 {strides = array<i32>} : memref<1x1024xf32, #tpu.memory_space<vmem>>, vector<1x1024xf32>,
    %c0_i32 = arith.constant 0 : i32
    %6 = arith.cmpi eq, %arg0, %c0_i32 : i32
    %7 = arith.extui %6 : i1 to i32
    %c0_i32_4 = arith.constant 0 : i32
    %8 = arith.cmpi ne, %7, %c0_i32_4 : i32
    scf.if %8 {
      %c0_7 = arith.constant 0 : index
      %c1 = arith.constant 1 : index
      %12 = vector.load %arg2[%c0_7, %c1] : memref<1x1024xf32, #tpu.memory_space<vmem>>, vector<1x1xf32>
      %13 = vector.broadcast %0 : f32 to vector<1x1xf32>
      %14 = arith.mulf %13, %12 : vector<1x1xf32>
      %c0_8 = arith.constant 0 : index
      %c0_9 = arith.constant 0 : index
      %15 = vector.load %arg4[%c0_8, %c0_9] : memref<1x1024xf32, #tpu.memory_space<vmem>>, vector<1x1xf32>
      tpu.vector_store %arg4[%c0_8, %c0_9], %14 {strides = array<i32>} : memref<1x1024xf32, #tpu.memory_space<vmem>>, vector<1x1xf32>,
    } else {
    }
    %c0_i32_5 = arith.constant 0 : i32
    %9 = arith.cmpi sgt, %arg0, %c0_i32_5 : i32
    %10 = arith.extui %9 : i1 to i32
    %c0_i32_6 = arith.constant 0 : i32
    %11 = arith.cmpi ne, %10, %c0_i32_6 : i32
    scf.if %11 {
      %c0_7 = arith.constant 0 : index
      %c127 = arith.constant 127 : index
      %12 = vector.load %arg3[%c0_7, %c127] : memref<1x128xf32, #tpu.memory_space<vmem>>, vector<1x1xf32>
      %13 = vector.broadcast %0 : f32 to vector<1x1xf32>
      %14 = arith.mulf %13, %12 : vector<1x1xf32>
      %c0_8 = arith.constant 0 : index
      %c0_9 = arith.constant 0 : index
      %15 = vector.load %arg4[%c0_8, %c0_9] : memref<1x1024xf32, #tpu.memory_space<vmem>>, vector<1x1xf32>
      tpu.vector_store %arg4[%c0_8, %c0_9], %14 {strides = array<i32>} : memref<1x1024xf32, #tpu.memory_space<vmem>>, vector<1x1xf32>,
    } else {
    }
    return
  }
  func.func @transform_0(%arg0: i32) -> i32 {
    %c0_i32 = arith.constant 0 : i32
    %c0_i32_0 = arith.constant 0 : i32
    return %c0_i32 : i32
  }
  func.func @transform_1(%arg0: i32) -> (i32, i32) {
    %c4_i32 = arith.constant 4 : i32
    %0 = arith.minsi %arg0, %c4_i32 : i32
    %c0_i32 = arith.constant 0 : i32
    %c0_i32_0 = arith.constant 0 : i32
    return %c0_i32, %0 : i32, i32
  }
  func.func @transform_2(%arg0: i32) -> (i32, i32) {
    %c8_i32 = arith.constant 8 : i32
    %0 = arith.muli %arg0, %c8_i32 : i32
    %c1_i32 = arith.constant 1 : i32
    %1 = arith.subi %0, %c1_i32 : i32
    %c0_i32 = arith.constant 0 : i32
    %2 = arith.maxsi %1, %c0_i32 : i32
    %c0_i32_0 = arith.constant 0 : i32
    %c0_i32_1 = arith.constant 0 : i32
    return %c0_i32_0, %2 : i32, i32
  }
  func.func @transform_3(%arg0: i32) -> (i32, i32) {
    %c0_i32 = arith.constant 0 : i32
    %c0_i32_0 = arith.constant 0 : i32
    return %c0_i32, %arg0 : i32, i32
  }
}

</mosaic_0001>

<bundles_post_ra>
// kernel: emphasis_apply.1
= control target key start
LH: loop header
LB: loop body
LE: loop exit
PB: predicated region body
PF: predicated region fallthrough
CT: control target
= control target key end

     0   :  { %s1129_s0 = inlined_call_operand.<no memory space> [shape: f32[1], index: 0, kind: input, shape index: {}]   ;;  %s1130_s1 = inlined_call_operand.hbm [shape: f32[1,4417], index: 1, kind: input, shape index: {}, may-alias: {1,2}]   ;;  %s1131_s2 = inlined_call_operand.hbm [shape: f32[1,4417], index: 2, kind: input, shape index: {}, may-alias: {1,2}]   ;;  %s1132_s3 = inlined_call_operand.hbm [shape: f32[1,4418], index: 3, kind: output, shape index: {}]  }
   0x1   :  { %8 = sst [smem:[#allocation2]] %s1129_s0 }
   0x2   :  { %9 = vsyncpa [#allocation4], 0 }
   0x3   :  { %11 = vsyncpa [#allocation4 + $0x1], 0 }
   0x4   :  { %12 = vsyncpa [#allocation7], 0 }
   0x5   :  { %14 = vsyncpa [#allocation7 + $0x1], 0 }
   0x6   :  { %15 = vsyncpa [#allocation5], 0 }
   0x7   :  { %17 = vsyncpa [#allocation5 + $0x1], 0  ;;  %s829_s14 = smov 0   ;;  %s831_s15 = smov 0  }
   0x8   :  { %s833_s16 = smov 0   ;;  %s835_s17 = smov 0  }
   0x9   :  { %s837_s18 = smov 0   ;;  %s839_s19 = smov 0  }
   0xa   :  { %s841_s20 = smov 0   ;;  %s843_s0 = smov 0  }
   0xb   :  { %s845_s21 = smov 0   ;;  %s847_s22 = smov 0  }
   0xc LB: > { %1139 = sst [smem:[#allocation12_spill]] %s771_s16  ;;  %s878_s23 = sadd.s32 4294967295, %s799_s22   ;;  %s799_s22 = sphi %s847_s22, %s1156_s22   ;;  %s795_s21 = sphi %s845_s21, %s1161_s21   ;;  %s791_s0 = sphi %s843_s0, %s1168_s0   ;;  %s787_s20 = sphi %s841_s20, %s1167_s20   ;;  %s783_s19 = sphi %s839_s19, %s1166_s19   ;;  %s779_s18 = sphi %s837_s18, %s1165_s18   ;;  %s775_s17 = sphi %s835_s17, %s1164_s17   ;;  %s771_s16 = sphi %s833_s16, %s1158_s16   ;;  %s767_s15 = sphi %s831_s15, %s1163_s15   ;;  %s763_s14 = sphi %s829_s14, %s1162_s14  }
   0xd   : > { %1140 = sst [smem:[#allocation13_spill]] %s795_s21  ;;  %s487_s24 = sadd.s32 4294967294, %s799_s22  }
   0xe   : > { %s882_s25 = sadd.s32 1, %s799_s22   ;;  %p48_p0 = scmp.lt.s32.totalorder %s799_s22, 4 }
   0xf   : > { %1141 = sst [smem:[#allocation14_spill]] %s882_s25  ;;  %p50_p1 = scmp.lt.s32.totalorder %s882_s25, 4 }
  0x10   : > { %s55_s26 = sadd.s32 1, %s795_s21  ;;  %p62_p2 = scmp.ne.s32.totalorder %s795_s21, %s791_s0 }
  0x11   : > { %s888_s27 = scalar_select %p48_p0, %s799_s22, 4 }
  0x12   : > { %s51_s28 = scalar_select %p50_p1, %s882_s25, 4 }
  0x13   : > { %p63_p3 = scmp.eq.s32.totalorder %s799_s22, 0  ;;  %p68_p4 = scmp.ne.s32.totalorder %s791_s0, %s787_s20 }
  0x14   : > { %s52_s29 = ssub.s32 %s888_s27, %s51_s28  ;;  %p69_p7 = scmp.eq.s32.totalorder %s878_s23, 0 }
  0x15   : > { %p53_p5 = scmp.eq.s32.totalorder %s52_s29, 0  ;;  %p898_p6 = por %p63_p3, %p62_p2 }
  0x16   : > { %s488_s4 = sshll.u32 %s799_s22, 3  ;;  %p909_p8 = por %p69_p7, %p68_p4 }
  0x17   : > { %s905_s5 = scalar_select %p53_p5, %s795_s21, %s55_s26  }
  0x18   : > { %s489_s7 = sadd.s32 4294967295, %s488_s4  ;;  %s510_s8 = sadd.s32 8, %s488_s4 }
  0x19   : > { %1143 = sst [smem:[#allocation15_spill]] %s905_s5  ;;  %p80_p9 = scmp.gt.s32.totalorder %s489_s7, 0 }
  0x1a   : > { %s491_s9 = sadd.s32 4294967295, %s510_s8  ;;  %s89_s10 = sadd.s32 1, %s783_s19 }
  0x1b   : > { %s1170_s7 = smov (!%p80_p9, %s489_s7), 0  ;;  %p84_p10 = scmp.gt.s32.totalorder %s491_s9, 0 }
  0x1c   : > { %p96_p11 = scmp.ne.s32.totalorder %s783_s19, %s779_s18  ;;  %p102_p12 = scmp.ne.s32.totalorder %s779_s18, %s775_s17 }
  0x1d   : > { %s112_s11 = ssub.s32 %s799_s22, %s882_s25  ;;  %s1172_s9 = smov (!%p84_p10, %s491_s9), 0 }
  0x1e   : > { %p924_p13 = por %p96_p11, %p63_p3  ;;  %p930_p0 = por %p102_p12, %p69_p7 }
  0x1f   : > { %s86_s20 = ssub.s32 %s1170_s7, %s1172_s9  ;;  %p113_p1 = scmp.eq.s32.totalorder %s112_s11, 0 }
  0x20   : > { %p87_p2 = scmp.eq.s32.totalorder %s86_s20, 0  ;;  %s115_s26 = sadd.s32 1, %s771_s16 }
  0x21   : > { %s937_s28 = scalar_select %p113_p1, %s771_s16, %s115_s26  }
  0x22   : > { %s940_s29 = scalar_select %p87_p2, %s783_s19, %s89_s10  }
  0x23   : > { %1147 = sst [smem:[#allocation16_spill]] %s937_s28  ;;  %p125_p4 = scmp.ne.s32.totalorder %s771_s16, %s767_s15 }
  0x24   : > { %1148 = sst [smem:[#allocation17_spill]] %s940_s29  ;;  %p126_p5 = scmp.eq.s32.totalorder %s878_s23, 4 }
  0x25   : > { %p131_p9 = scmp.ne.s32.totalorder %s767_s15, %s763_s14  ;;  %p132_p3 = scmp.eq.s32.totalorder %s487_s24, 4 }
  0x26   : > { %p949_p10 = por %p126_p5, %p125_p4  ;;  %p493_p11 = scmp.ge.s32.totalorder %s799_s22, 5 }
  0x27   : > { %p953_p7 = por %p132_p3, %p131_p9 }
  0x28   : > { %s1149_s17 = scalar_select %p949_p10, 1, 0 }
  0x29   : > { %s1150_s4 = scalar_select %p953_p7, 1, 0 }
  0x2a   : > { %151 = sbr.rel (%p493_p11) target bundleno = 97 (0x61), region = 20 }
  0x2b   : > { %1151 = sst [smem:[#allocation18_spill]] %s1150_s4 }
  0x2f   : > { %154 = sbr.rel (!%p898_p6) target bundleno = 82 (0x52), region = 24  ;;  %s155_s8 = sand.u32 (%p898_p6), 1, %s795_s21  }
  0x30   : > { %s495_s9 = sshll.u32 (%p898_p6), %s888_s27, 3  ;;  %s494_s10 = sshll.u32 (%p898_p6), %s155_s8, 3 }
  0x31   : > { %s163_s24 = ssub.s32 (%p898_p6), 35, %s495_s9  ;;  %s965_s26 = scalar_lea.sflag (%p898_p6), [#allocation4], %s155_s8 }
  0x32   : > { %p164_p12 = scmp.lt.s32.totalorder (%p898_p6), %s163_s24, 8  ;;  %s159_s5 = scalar_lea.vmem (%p898_p6), [#allocation3], %s494_s10 }
  0x34   : > { %s1174_s24 = smov (!%p164_p12, %s163_s24), 8 }
  0x35   : > { %s166_s11 = ssub.s32 8, %s1174_s24 }
  0x36   : > { %s167_s20 = sshll.u32 %s166_s11, 4 }
  0x37   : > { %168 = vsyncadd %s965_s26, %s167_s20  ;;  %p496_p6 = scmp.ne.s32.totalorder %s1174_s24, 0  ;;  %s170_s21 = scalar_lea.hbm %s1130_s1, %s495_s9 }
  0x38   : > { %s1135_s29 = sshll.u32 %s1174_s24, 4  ;;  %s172_s28 = sshll.u32 %s170_s21, 4  ;;  %s973_s28 = int_to_ptr.hbm [resolvable:$true] %s172_s28 }
  0x39   : > { %s975_s11 = sshll.u32 %s159_s5, 4  ;;  %s603_s8 = sshra.s32 %s973_s28, 4  ;;  %s175_s11 = int_to_ptr.vmem [resolvable:$true] %s975_s11  ;;  %s604_s8 = int_to_ptr.hbm [resolvable:$true] %s603_s8 }
  0x3a   : > { %s605_s10 = sshrl.u32 %s1135_s29, 4  ;;  %s614_s21 = scalar_lea.hbm %s1130_s1, 35 }
  0x3b   : > { %s610_s20 = scalar_lea.hbm %s604_s8, %s605_s10  ;;  %p615_p5 = scmp.lt.s32.totalorder %s604_s8, %s1130_s1 }
  0x3c   : > { %p611_p1 = scmp.ne.s32.totalorder %s604_s8, %s610_s20  ;;  %p616_p9 = scmp.lt.s32.totalorder %s614_s21, %s610_s20 }
  0x3e   : > { %p612_p2 = pnand %p611_p1, %p496_p6  ;;  %p617_p3 = por %p616_p9, %p615_p5 }
  0x40   : > { %p613_p4 = pneg %p612_p2 }
  0x42   : > { %p618_p11 = pnand %p617_p3, %p613_p4 }
  0x44   : > { %621 = shalt.err (!%p618_p11)
}
  0x45   : > { %s622_s5 = sshra.s32 %s175_s11, 4  ;;  %s801_s25 = smov [#allocation3]   ;;  %s623_s5 = int_to_ptr.vmem [resolvable:$true] %s622_s5 }
  0x46   : > { %s629_s29 = scalar_lea.vmem %s623_s5, %s605_s10  ;;  %s633_s4 = scalar_lea.vmem %s801_s25, 16 }
  0x47   : > { %p630_p12 = scmp.ne.s32.totalorder %s623_s5, %s629_s29  ;;  %p635_p7 = scmp.lt.s32.totalorder %s633_s4, %s629_s29 }
  0x49   : > { %p631_p1 = pnand %p630_p12, %p496_p6 }
  0x4b   : > { %p632_p2 = pneg %p631_p1 }
  0x4d   : > { %p637_p10 = pnand %p635_p7, %p632_p2 }
  0x4f   : > { %640 = shalt.err (!%p637_p10)
}
  0x50   : > { %s1152_s16 = sshll.u32 %s1174_s24, 4 }
  0x51   : > { %177 = dma.hbm_to_vmem [thread:$0]  (%p496_p6), %s973_s28, %s1152_s16, %s175_s11, %s965_s26  }
  0x52 PF: > { %s181_s8 = sand.u32 1, %s783_s19   ;;  %s191_s30 = scalar_lea.hbm %s1131_s2, %s1170_s7 }
  0x53   : > { %s193_s25 = sshll.u32 %s191_s30, 4  ;;  %s184_s29 = scalar_lea.vmem [#allocation6], %s181_s8  ;;  %s194_s25 = int_to_ptr.hbm [resolvable:$true] %s193_s25 }
  0x54   : > { %s195_s4 = sshll.u32 %s184_s29, 4  ;;  %s182_s9 = scalar_lea.sflag [#allocation7], %s181_s8  ;;  %s196_s4 = int_to_ptr.vmem [resolvable:$true] %s195_s4 }
  0x55   : > { %s642_s21 = sshra.s32 %s194_s25, 4  ;;  %s648_s11 = scalar_lea.hbm %s1131_s2, 35  ;;  %s643_s21 = int_to_ptr.hbm [resolvable:$true] %s642_s21 }
  0x56   : > { %s644_s24 = scalar_lea.hbm %s643_s21, 1  ;;  %p649_p4 = scmp.lt.s32.totalorder %s643_s21, %s1131_s2 }
  0x57   : > { %p645_p10 = scmp.ne.s32.totalorder %s643_s21, %s644_s24  ;;  %p650_p5 = scmp.lt.s32.totalorder %s648_s11, %s644_s24 }
  0x59   : > { %p646_p7 = pnand %p645_p10, %p924_p13  ;;  %p651_p9 = por %p650_p5, %p649_p4 }
  0x5b   : > { %p647_p6 = pneg %p646_p7 }
  0x5d   : > { %p652_p3 = pnand %p651_p9, %p647_p6 }
  0x5f   : > { %655 = shalt.err (!%p652_p3)
}
  0x60   : > { %511 = dma.hbm_to_vmem [thread:$0]  (%p924_p13), %s194_s25, 16, %s196_s4, %s182_s9  }
  0x61 PF: > { %p499_p11 = scmp.ge.s32.totalorder %s799_s22, 1  ;;  %p200_p12 = scmp.lt.s32.totalorder %s799_s22, 6 }
  0x63   : > { %p201_p1 = pnand %p499_p11, %p200_p12 }
  0x64   : > { %s206_s7 = sand.u32 (!%p201_p1), 1, %s791_s0  }
  0x65   : > { %204 = sbr.rel (%p201_p1) target bundleno = 534 (0x216), region = 32  ;;  %s1015_s16 = sshll.u32 (!%p201_p1), %s206_s7, 3 }
  0x66   : > { %s207_s8 = scalar_lea.sflag (!%p201_p1), [#allocation4], %s206_s7  ;;  %s210_s10 = scalar_lea.vmem (!%p201_p1), [#allocation3], %s1015_s16 }
  0x6a   : > { %750 = dma.done.wait (%p909_p8), %s207_s8, 128  }
  0x6b   : > { %752 = vsyncadd (%p909_p8), %s207_s8, 4294967168  ;;  %s216_s12 = sand.u32 1, %s779_s18  }
  0x6c   : > { %s217_s20 = scalar_lea.sflag [#allocation7], %s216_s12  ;;  %s1023_s30 = scalar_lea.vmem [#allocation6], %s216_s12 }
  0x6d   : > { %754 = dma.done.wait (%p930_p0), %s217_s20, 16  }
  0x6e   : > { %756 = vsyncadd (%p930_p0), %s217_s20, 4294967280  ;;  %v262_v0 = vld [vmem:[%s210_s10] sm:$0xff]  ;;  %s802_s25 = smov 1   ;;  %v296_v10 = vlaneseq  ;;  %s261_s6 = sld [smem:[#allocation2]]  ;;  %vm331_vm1 = vcmask 1040384   ;;  %vm337_vm2 = vcmask 1044484  }
  0x6f   : > { %v266_v1 = vperm.slane %v262_v0, 2  ;;  %v264_v2 = vperm.slane %v262_v0, 0  ;;  %v268_v3 = vperm.slane %v262_v0, 4  ;;  %v267_v4 = vperm.slane %v262_v0, 3  ;;  %s244_s13 = sand.u32 1, %s767_s15   ;;  %p502_p8 = scmp.ne.s32.totalorder %s878_s23, 0 }
  0x70   : > { %v265_v5 = vperm.slane %v262_v0, 1  ;;  %v269_v6 = vperm.slane %v262_v0, 5  ;;  %v271_v7 = vperm.slane %v262_v0, 7  ;;  %v270_v8 = vperm.slane %v262_v0, 6  ;;  %s501_s29 = sshll.u32 %s244_s13, 3  ;;  %s803_s9 = smov (!%p502_p8), 127  }
  0x71   : > { %284 = vrot.lane.b32.xlu1 %v266_v1, %s802_s25  ;;  %280 = vrot.lane.b32.xlu0 %v264_v2, %s802_s25  ;;  %v297_v13 = vand.u32 127, %v296_v10  ;;  %vm333_vm3 = vcmask 1042434   ;;  %vm335_vm4 = vcmask 1041408   ;;  %vm339_vm5 = vcmask 1046534   ;;  %s1044_s4 = scalar_lea.vmem [#allocation8], %s501_s29 }
  0x72   : > { %288 = vrot.lane.b32.xlu2 %v268_v3, %s802_s25  ;;  %vm341_vm6 = vcmask 1045508   ;;  %vm343_vm7 = vcmask 1043456  }
  0x73   : > { %vm298_vm0 = vcmp.lt.s32.totalorder %v297_v13, 1 }
  0x74   : > { %v307_v17 = vstv %s261_s6 }
  0x79   : > { %286 = vrot.lane.b32.xlu1 %v267_v4, %s802_s25  ;;  %282 = vrot.lane.b32.xlu0 %v265_v5, %s802_s25 }
  0x7a   : > { %290 = vrot.lane.b32.xlu2 %v269_v6, %s802_s25 }
  0x81   : > { %294 = vrot.lane.b32.xlu1 %v271_v7, %s802_s25  ;;  %292 = vrot.lane.b32.xlu0 %v270_v8, %s802_s25 }
  0xcc   : > { %v289_v9 = vpop.permute.xlu2 %288 }
  0xd4   : > { %v291_v14 = vpop.permute.xlu2 %290 }
  0xd5   : > { %v301_v18 = vsel %vm298_vm0, %v289_v9, %v291_v14 }
  0xd6   : > { %v313_v23 = vmul.f32 %v307_v17, %v301_v18 }
  0xd8   : > { %v328_v28 = vrot.slane %v313_v23, 3 }
  0xe3   : > { %v285_v11 = vpop.permute.xlu1 %284  ;;  %v281_v12 = vpop.permute.xlu0 %280 }
  0xeb   : > { %v287_v15 = vpop.permute.xlu1 %286  ;;  %v283_v16 = vpop.permute.xlu0 %282 }
  0xec   : > { %v302_v19 = vsel %vm298_vm0, %v287_v15, %v289_v9  ;;  %v303_v20 = vsel %vm298_vm0, %v285_v11, %v287_v15  ;;  %v305_v21 = vsel %vm298_vm0, %v281_v12, %v283_v16  ;;  %v304_v22 = vsel %vm298_vm0, %v283_v16, %v285_v11 }
  0xed   : > { %v311_v24 = vmul.f32 %v307_v17, %v303_v20  ;;  %v312_v25 = vmul.f32 %v307_v17, %v302_v19  ;;  %v309_v26 = vmul.f32 %v307_v17, %v305_v21  ;;  %v310_v27 = vmul.f32 %v307_v17, %v304_v22 }
  0xef   : > { %v326_v29 = vrot.slane %v311_v24, 5  ;;  %v327_v30 = vrot.slane %v312_v25, 4  ;;  %v324_v33 = vrot.slane %v309_v26, 7  ;;  %v325_v37 = vrot.slane %v310_v27, 6 }
  0xf1   : > { %v338_v44 = vsel %vm337_vm2, %v327_v30, %v328_v28  ;;  %v334_v45 = vsel %vm333_vm3, %v325_v37, %v326_v29 }
  0xf3   : > { %v295_v31 = vpop.permute.xlu1 %294  ;;  %v293_v32 = vpop.permute.xlu0 %292 }
  0xf4   : > { %v306_v34 = vsel %vm298_vm0, %v295_v31, %v281_v12  ;;  %v299_v35 = vsel %vm298_vm0, %v293_v32, %v295_v31  ;;  %v300_v36 = vsel %vm298_vm0, %v291_v14, %v293_v32 }
  0xf5   : > { %v308_v38 = vmul.f32 %v307_v17, %v306_v34  ;;  %v314_v39 = vmul.f32 %v307_v17, %v300_v36  ;;  %v315_v40 = vmul.f32 %v307_v17, %v299_v35 }
  0xf7   : > { %v332_v41 = vsel %vm331_vm1, %v308_v38, %v324_v33  ;;  %v329_v42 = vrot.slane %v314_v39, 2  ;;  %v330_v43 = vrot.slane %v315_v40, 1 }
  0xf8   : > { %v336_v47 = vsel %vm335_vm4, %v332_v41, %v334_v45  ;;  %350 = sbr.rel (%p502_p8) target bundleno = 372 (0x174), region = 44 }
  0xf9   : > { %v340_v46 = vsel %vm339_vm5, %v329_v42, %v330_v43 }
  0xfa   : > { %v342_v48 = vsel %vm341_vm6, %v338_v44, %v340_v46 }
  0xfb   : > { %v344_v49 = vsel %vm343_vm7, %v336_v47, %v342_v48 }
  0xfc   : > { %346 = vst [vmem:[%s1044_s4] sm:$0xff] %v344_v49 }
  0xfd   : > { %v351_v50 = vld [vmem:[%s210_s10] sm:$0x1]  ;;  %vm359_vm8 = vcmp.lt.s32.totalorder %v296_v10, 1 }
  0xfe   : > { %v352_v51 = vmul.f32 %v351_v50, %v307_v17 }
 0x100   : > { %354 = vrot.lane.b32.xlu0 %v352_v51, %s803_s9 }
 0x172   : > { %v355_v52 = vpop.permute.xlu0 %354 }
 0x173   : > { %361 = vst.msk [vmem:[%s1044_s4] sm:$0x1] %vm359_vm8, %v355_v52 }
 0x174 PF: > { %p503_p13 = scmp.le.s32.totalorder %s878_s23, 0 }
 0x175   : > { %s804_s21 = smov (!%p503_p13), 1  }
 0x176   : > { %365 = sbr.rel (%p503_p13) target bundleno = 498 (0x1f2), region = 48 }
 0x17b   : > { %v366_v53 = vld [vmem:[%s1023_s30] sm:$0x1]  ;;  %vm374_vm9 = vcmp.lt.s32.totalorder %v296_v10, 1 }
 0x17c   : > { %v367_v54 = vmul.f32 %v366_v53, %v307_v17 }
 0x17e   : > { %369 = vrot.lane.b32.xlu0 %v367_v54, %s804_s21 }
 0x1f0   : > { %v370_v55 = vpop.permute.xlu0 %369 }
 0x1f1   : > { %376 = vst.msk [vmem:[%s1044_s4] sm:$0x1] %vm374_vm9, %v370_v55 }
 0x1f2 PF: > { %s1058_s24 = scalar_lea.sflag [#allocation5], %s244_s13  ;;  %p1153_p0 = scmp.ne.s32.totalorder %s1149_s17, 0 }
 0x1f3   : > { %s505_s28 = sshll.u32 (%p1153_p0), %s878_s23, 3 }
 0x1f4   : > { %384 = sbr.rel (!%p1153_p0) target bundleno = 534 (0x216), region = 52  ;;  %s386_s26 = ssub.s32 (%p1153_p0), 35, %s505_s28 }
 0x1f5   : > { %p387_p2 = scmp.lt.s32.totalorder (%p1153_p0), %s386_s26, 8 }
 0x1f9   : > { %s1176_s26 = smov (!%p387_p2, %s386_s26), 8 }
 0x1fa   : > { %s389_s11 = ssub.s32 8, %s1176_s26 }
 0x1fb   : > { %s390_s27 = sshll.u32 %s389_s11, 4 }
 0x1fc   : > { %391 = vsyncadd %s1058_s24, %s390_s27  ;;  %p506_p10 = scmp.ne.s32.totalorder %s1176_s26, 0  ;;  %s393_s7 = scalar_lea.hbm %s1132_s3, %s505_s28 }
 0x1fd   : > { %s394_s16 = sshll.u32 %s1176_s26, 4  ;;  %s395_s23 = sshll.u32 %s1044_s4, 4  ;;  %s1073_s23 = int_to_ptr.vmem [resolvable:$true] %s395_s23 }
 0x1fe   : > { %s397_s8 = sshll.u32 %s393_s7, 4  ;;  %s670_s10 = sshra.s32 %s1073_s23, 4  ;;  %s398_s8 = int_to_ptr.hbm [resolvable:$true] %s397_s8  ;;  %s671_s10 = int_to_ptr.vmem [resolvable:$true] %s670_s10 }
 0x1ff   : > { %s672_s12 = sshrl.u32 %s394_s16, 4  ;;  %s805_s30 = smov [#allocation8]  }
 0x200   : > { %s677_s20 = scalar_lea.vmem %s671_s10, %s672_s12  ;;  %s681_s25 = scalar_lea.vmem %s805_s30, 16 }
 0x201   : > { %p678_p7 = scmp.ne.s32.totalorder %s671_s10, %s677_s20  ;;  %p683_p5 = scmp.lt.s32.totalorder %s681_s25, %s677_s20 }
 0x203   : > { %p679_p6 = pnand %p678_p7, %p506_p10 }
 0x205   : > { %p680_p4 = pneg %p679_p6 }
 0x207   : > { %p685_p9 = pnand %p683_p5, %p680_p4 }
 0x209   : > { %688 = shalt.err (!%p685_p9)
}
 0x20a   : > { %s689_s6 = sshra.s32 %s398_s8, 4  ;;  %s700_s9 = scalar_lea.hbm %s1132_s3, 35  ;;  %s690_s6 = int_to_ptr.hbm [resolvable:$true] %s689_s6 }
 0x20b   : > { %s696_s13 = scalar_lea.hbm %s690_s6, %s672_s12  ;;  %p701_p1 = scmp.lt.s32.totalorder %s690_s6, %s1132_s3 }
 0x20c   : > { %p697_p3 = scmp.ne.s32.totalorder %s690_s6, %s696_s13  ;;  %p702_p8 = scmp.lt.s32.totalorder %s700_s9, %s696_s13 }
 0x20e   : > { %p698_p11 = pnand %p697_p3, %p506_p10  ;;  %p703_p13 = por %p702_p8, %p701_p1 }
 0x210   : > { %p699_p12 = pneg %p698_p11 }
 0x212   : > { %p704_p0 = pnand %p703_p13, %p699_p12 }
 0x214   : > { %707 = shalt.err (!%p704_p0)
}
 0x215   : > { %400 = dma.vmem_to_hbm [thread:$0]  (%p506_p10), %s1073_s23, %s394_s16, %s398_s8, %s1058_s24  }
 0x216 PF: > { %s1154_s11 = sld [smem:[#allocation18_spill]]  ;;  %p519_p2 = scmp.ge.s32.totalorder %s799_s22, 2 }
 0x217   : > { %s409_s27 = sand.u32 1, %s763_s14  }
 0x218   : > { %s410_s5 = scalar_lea.sflag [#allocation5], %s409_s27 }
 0x21c   : > { %p1155_p7 = scmp.ne.s32.totalorder %s1154_s11, 0 }
 0x21e   : > { %p516_p6 = pnand %p519_p2, %p1155_p7 }
 0x220   : > { %p517_p4 = pneg %p516_p6 }
 0x222   : > { %758 = dma.done.wait (%p517_p4), %s410_s5, 128  }
 0x223   : > { %760 = vsyncadd (%p517_p4), %s410_s5, 4294967168  ;;  %s1156_s22 = sld [smem:[#allocation14_spill]]  ;;  %s1162_s14 = smov %s767_s15 }
 0x224   : > { %s1157_s17 = sld [smem:[#allocation12_spill]]  ;;  %s1167_s20 = smov %s791_s0 }
 0x225   : > { %s1158_s16 = sld [smem:[#allocation16_spill]] }
 0x226   : > { %s1159_s24 = sld [smem:[#allocation17_spill]] }
 0x227   : > { %s1160_s26 = sld [smem:[#allocation13_spill]] }
 0x228   : > { %s1161_s21 = sld [smem:[#allocation15_spill]] }
 0x229   : > { %p20_p10 = scmp.ge.s32.totalorder %s1156_s22, 7  }
 0x22a   : > { %s1163_s15 = smov %s1157_s17  ;;  %s1164_s17 = smov %s779_s18 }
 0x22b   : > { %s1165_s18 = smov %s783_s19  ;;  %22 = sbr.rel (!%p20_p10) target bundleno = 12 (0xc), region = 98 }
 0x22c   : > { %s1166_s19 = smov %s1159_s24 }
 0x22d   : > { %s1168_s0 = smov %s1160_s26 }
 0x230   :  { %416 = vsyncpa [#allocation4], 1 }
 0x231   :  { %418 = vsyncpa [#allocation4 + $0x1], 1 }
 0x232   :  { %419 = vsyncpa [#allocation7], 1 }
 0x233   :  { %421 = vsyncpa [#allocation7 + $0x1], 1 }
 0x234   :  { %422 = vsyncpa [#allocation5], 1 }
 0x235   :  { %424 = vsyncpa [#allocation5 + $0x1], 1 }

</bundles_post_ra>
